<compile_context>
chip_gen: v7x
topology: tpu7x:2x2x1
jax: 0.10.0
libtpu: 0.0.40
codegen_flags: <defaults>
</compile_context>

<pallas_src>
from typing import NamedTuple

import jax
import jax.numpy as jnp
from jax.experimental import pallas as pl
from jax.experimental.pallas import tpu as pltpu


def _round_up(x: int, m: int) -> int:
    return (x + m - 1) // m * m


def _cdiv(a: int, b: int) -> int:
    return (a + b - 1) // b


def _vmem_budget_bytes() -> int:
    """~75% of physical VMEM: ~48 MiB on v7x (64 MiB/TC), ~96 MiB on v5e/v6e."""
    try:
        cap = int(pltpu.get_tpu_info().vmem_capacity_bytes)
    except Exception:
        cap = 64 << 20  # conservative (v7x-sized) default
    return max(32 << 20, min((cap * 3) // 4, 112 << 20))


class SwigluPlan(NamedTuple):
    d: int
    d_ff: int
    d_pad: int
    dff_pad: int
    tm: int
    tff: int
    vmem_limit: int
    compute_dtype: jnp.dtype
    out_dtype: jnp.dtype


def make_swiglu_plan(n, d, d_ff, *, out_dtype=jnp.float32,
                     compute_dtype=jnp.bfloat16, block_m=None) -> SwigluPlan:
    cdt = jnp.dtype(compute_dtype)
    odt = jnp.dtype(out_dtype)
    bpe = cdt.itemsize
    out_bpe = odt.itemsize
    sublane = 8 * max(1, 4 // bpe)  # 8 rows per tile for f32, 16 for bf16

    budget = _vmem_budget_bytes()

    d_pad = _round_up(d, 128)
    dff128 = _round_up(d_ff, 128)

    if block_m is None:
        # 128-MiB parts (v5e/v6e): bigger token tile; v7x: keep 256.
        block_m = 512 if budget >= (80 << 20) else 256

    # Token tile: as large as the budget/row-count allows, but keep >= 2 grid
    # steps on the token ("parallel") axis when possible so both v7x TCs work.
    tm = max(sublane, min(_round_up(block_m, sublane), _round_up(n, sublane)))
    if _cdiv(n, tm) < 2 and tm > sublane:
        tm = max(sublane, _round_up(_cdiv(n, 2), sublane))

    def step_vmem(tm_, tff_):
        xo = 2 * tm_ * d_pad * (bpe + out_bpe)        # double-buffered x / out tiles
        acc = tm_ * d_pad * 4                         # f32 fc2 accumulator (scratch)
        w = 2 * 3 * d_pad * tff_ * bpe                # double-buffered w1/w3/w2 chunks
        bias = 2 * (2 * tff_ + d_pad) * 4             # f32 bias chunks
        inter = 3 * tm_ * tff_ * 4 + tm_ * d_pad * 4  # f32 h1/h3/h + epilogue temp
        return xo + acc + w + bias + inter

    def pick_tff(tm_):
        if step_vmem(tm_, dff128) <= budget:
            return dff128                             # weights fully resident, 1 d_ff step
        c = max(256, (dff128 // 256) * 256)           # 256-aligned chunks (v6e/v7x MXU)
        while c > 256 and step_vmem(tm_, c) > budget:
            c -= 256
        return c

    tff = pick_tff(tm)
    if step_vmem(tm, tff) > budget and tm > max(sublane, 256):
        tm = max(sublane, 256)
        tff = pick_tff(tm)

    dff_pad = _round_up(d_ff, tff)                    # zero-padded -> exact math
    return SwigluPlan(d, d_ff, d_pad, dff_pad, tm, tff, budget, cdt, odt)


def prepare_swiglu_weights(plan: SwigluPlan, w1, b1, w3, b3, w2, b2):
    """Cast + zero-pad the weights once at model setup (hoisted off the hot path)."""
    cdt = plan.compute_dtype
    d, d_ff, d_pad, dff_pad = plan.d, plan.d_ff, plan.d_pad, plan.dff_pad
    w1_p = jnp.zeros((d_pad, dff_pad), cdt).at[:d, :d_ff].set(w1.astype(cdt))
    w3_p = jnp.zeros((d_pad, dff_pad), cdt).at[:d, :d_ff].set(w3.astype(cdt))
    w2_p = jnp.zeros((dff_pad, d_pad), cdt).at[:d_ff, :d].set(w2.astype(cdt))
    b1_p = jnp.zeros((1, dff_pad), jnp.float32).at[0, :d_ff].set(b1.astype(jnp.float32))
    b3_p = jnp.zeros((1, dff_pad), jnp.float32).at[0, :d_ff].set(b3.astype(jnp.float32))
    b2_p = jnp.zeros((1, d_pad), jnp.float32).at[0, :d].set(b2.astype(jnp.float32))
    return (w1_p, b1_p, w3_p, b3_p, w2_p, b2_p)


def swiglu_ffn_kernel(x_ref, w1_ref, b1_ref, w3_ref, b3_ref, w2_ref, b2_ref,
                      o_ref, acc_ref):
    # x_ref: (tm, d_pad)      w1/w3: (d_pad, tff)   b1/b3: (1, tff)  [f32]
    # w2:    (tff, d_pad)     b2: (1, d_pad) [f32]  o_ref: (tm, d_pad)
    # acc_ref: (tm, d_pad) f32 scratch accumulator over the d_ff chunks.
    k = pl.program_id(1)

    @pl.when(k == 0)
    def _():
        acc_ref[...] = jnp.zeros_like(acc_ref)

    x = x_ref[...]
    # fc1 / fc3 for this d_ff chunk: MXU matmuls with f32 accumulation + f32 bias.
    h1 = jnp.dot(x, w1_ref[...], preferred_element_type=jnp.float32) + b1_ref[...]
    h3 = jnp.dot(x, w3_ref[...], preferred_element_type=jnp.float32) + b3_ref[...]
    # silu(fc1) * fc3 stays in f32 (VPU + EUP work; free filler while MXU-bound).
    h = (h1 * jax.nn.sigmoid(h1)) * h3
    # Partial fc2 contribution of this chunk, accumulated in f32.
    acc_ref[...] += jnp.dot(h.astype(w2_ref.dtype), w2_ref[...],
                            preferred_element_type=jnp.float32)

    @pl.when(k == pl.num_programs(1) - 1)
    def _():
        o_ref[...] = (acc_ref[...] + b2_ref[...]).astype(o_ref.dtype)


def swiglu_ffn_apply(plan: SwigluPlan, x, prepared):
    orig_shape = x.shape
    d, d_pad, dff_pad, tm, tff = plan.d, plan.d_pad, plan.dff_pad, plan.tm, plan.tff
    cdt, odt = plan.compute_dtype, plan.out_dtype
    bpe, out_bpe = cdt.itemsize, odt.itemsize

    x2 = x.reshape(-1, d)
    n = x2.shape[0]
    # Only the feature dim is padded; the ragged last token tile is handled by
    # the cdiv grid (OOB rows of the last block are dropped on writeback).
    x_p = jnp.pad(x2, ((0, 0), (0, d_pad - d))).astype(cdt)

    grid = (_cdiv(n, tm), dff_pad // tff)
    weight_bytes = 3 * d_pad * dff_pad * bpe
    cost = pl.CostEstimate(
        flops=6 * n * d_pad * dff_pad,
        transcendentals=n * dff_pad,
        bytes_accessed=n * d_pad * (bpe + out_bpe)
        + weight_bytes * (grid[0] if grid[1] > 1 else 1)
        + (2 * dff_pad + d_pad) * 4,
    )

    out = pl.pallas_call(
        swiglu_ffn_kernel,
        out_shape=jax.ShapeDtypeStruct((n, d_pad), odt),
        grid_spec=pltpu.PrefetchScalarGridSpec(
            num_scalar_prefetch=0,
            grid=grid,
            in_specs=[
                pl.BlockSpec((tm, d_pad), lambda i, k: (i, 0)),    # x tile
                pl.BlockSpec((d_pad, tff), lambda i, k: (0, k)),   # w1 chunk
                pl.BlockSpec((1, tff), lambda i, k: (0, k)),       # b1 chunk
                pl.BlockSpec((d_pad, tff), lambda i, k: (0, k)),   # w3 chunk
                pl.BlockSpec((1, tff), lambda i, k: (0, k)),       # b3 chunk
                pl.BlockSpec((tff, d_pad), lambda i, k: (k, 0)),   # w2 chunk
                pl.BlockSpec((1, d_pad), lambda i, k: (0, 0)),     # b2
            ],
            out_specs=pl.BlockSpec((tm, d_pad), lambda i, k: (i, 0)),
            scratch_shapes=[pltpu.VMEM((tm, d_pad), jnp.float32)],
        ),
        compiler_params=pltpu.CompilerParams(
            dimension_semantics=("parallel", "arbitrary"),
            vmem_limit_bytes=plan.vmem_limit,
        ),
        cost_estimate=cost,
    )(x_p, *prepared)

    return out[:, :d].reshape(orig_shape)


def swiglu_ffn(x, w1, b1, w3, b3, w2, b2, *, compute_dtype=jnp.bfloat16, block_m=None):
    """One-shot convenience wrapper: fc2(silu(fc1(x)) * fc3(x)).

    x: (..., d); weights already in [in, out] layout; biases [out].
    For repeated calls, build the plan / prepared weights once and reuse them.
    """
    d = x.shape[-1]
    d_ff = w1.shape[1]
    n = 1
    for s in x.shape[:-1]:
        n *= int(s)
    plan = make_swiglu_plan(n, d, d_ff, out_dtype=x.dtype,
                            compute_dtype=compute_dtype, block_m=block_m)
    prepared = prepare_swiglu_weights(plan, w1, b1, w3, b3, w2, b2)
    return swiglu_ffn_apply(plan, x, prepared)


def reference_swiglu(x, w1, b1, w3, b3, w2, b2):
    h1 = x @ w1 + b1
    h3 = x @ w3 + b3
    return (jax.nn.silu(h1) * h3) @ w2 + b2


if __name__ == "__main__":
    # Config-like small sizes: hidden_size=32, intermediate_size=64, use_bias=True.
    batch, seq, hidden, inter = 2, 8, 32, 64

    key = jax.random.PRNGKey(0)
    kx, k1, kb1, k3, kb3, k2, kb2 = jax.random.split(key, 7)

    x = jax.random.normal(kx, (batch, seq, hidden), dtype=jnp.float32)

    # PyTorch nn.Linear weights are [out, in]; stored here pre-transposed [in, out].
    w1 = jax.random.normal(k1, (hidden, inter), dtype=jnp.float32) * 0.05
    b1 = jax.random.normal(kb1, (inter,), dtype=jnp.float32) * 0.05
    w3 = jax.random.normal(k3, (hidden, inter), dtype=jnp.float32) * 0.05
    b3 = jax.random.normal(kb3, (inter,), dtype=jnp.float32) * 0.05
    w2 = jax.random.normal(k2, (inter, hidden), dtype=jnp.float32) * 0.05
    b2 = jax.random.normal(kb2, (hidden,), dtype=jnp.float32) * 0.05

    ref = reference_swiglu(x, w1, b1, w3, b3, w2, b2)

    # Default path: bf16 MXU inputs with f32 accumulation (bf16-level tolerance).
    out_bf16 = jax.block_until_ready(swiglu_ffn(x, w1, b1, w3, b3, w2, b2))
    assert out_bf16.shape == x.shape
    assert jnp.allclose(out_bf16, ref, atol=1e-2, rtol=5e-2), "bf16 path mismatch"

    # Full-precision path (f32 MXU inputs).
    out_f32 = jax.block_until_ready(
        swiglu_ffn(x, w1, b1, w3, b3, w2, b2, compute_dtype=jnp.float32))
    assert jnp.allclose(out_f32, ref, atol=2e-3, rtol=2e-3), "f32 path mismatch"

    print("KERNEL_OK")
</pallas_src>

<mosaic_0001>
module attributes {stable_mosaic.version = 11 : i64} {
  func.func @swiglu_ffn_kernel(%arg0: i32, %arg1: i32, %arg2: memref<16x128xbf16, #tpu.memory_space<vmem>>, %arg3: memref<128x128xbf16, #tpu.memory_space<vmem>>, %arg4: memref<1x128xf32, #tpu.memory_space<vmem>>, %arg5: memref<128x128xbf16, #tpu.memory_space<vmem>>, %arg6: memref<1x128xf32, #tpu.memory_space<vmem>>, %arg7: memref<128x128xbf16, #tpu.memory_space<vmem>>, %arg8: memref<1x128xf32, #tpu.memory_space<vmem>>, %arg9: memref<16x128xf32, #tpu.memory_space<vmem>>, %arg10: memref<16x128xf32, #tpu.memory_space<vmem>>) attributes {dimension_semantics = [#tpu.dimension_semantics<parallel>, #tpu.dimension_semantics<arbitrary>], iteration_bounds = array<i64: 1, 1>, scalar_prefetch = 0 : i64, scratch_operands = 1 : i64, tpu.core_type = #tpu.core_type<tc>, window_params = [{transform_indices = @transform_0, window_bounds = array<i64: 16, 128>}, {transform_indices = @transform_1, window_bounds = array<i64: 128, 128>}, {transform_indices = @transform_2, window_bounds = array<i64: 1, 128>}, {transform_indices = @transform_3, window_bounds = array<i64: 128, 128>}, {transform_indices = @transform_4, window_bounds = array<i64: 1, 128>}, {transform_indices = @transform_5, window_bounds = array<i64: 128, 128>}, {pipeline_mode = #tpu.pipeline_mode<synchronous>, transform_indices = @transform_6, window_bounds = array<i64: 1, 128>}, {transform_indices = @transform_7, window_bounds = array<i64: 16, 128>}]} {
    %c0_i32 = arith.constant 0 : i32
    %0 = arith.cmpi eq, %arg1, %c0_i32 : i32
    %1 = arith.extui %0 : i1 to i32
    %c0_i32_0 = arith.constant 0 : i32
    %2 = arith.cmpi ne, %1, %c0_i32_0 : i32
    scf.if %2 {
      %cst_21 = arith.constant 0.000000e+00 : f32
      %30 = vector.broadcast %cst_21 : f32 to vector<16x128xf32>
      %c0_22 = arith.constant 0 : index
      %c0_23 = arith.constant 0 : index
      %31 = vector.load %arg10[%c0_22, %c0_23] : memref<16x128xf32, #tpu.memory_space<vmem>>, vector<16x128xf32>
      tpu.vector_store %arg10[%c0_22, %c0_23], %30 {strides = array<i32>} : memref<16x128xf32, #tpu.memory_space<vmem>>, vector<16x128xf32>,
    } else {
    }
    %c0 = arith.constant 0 : index
    %c0_1 = arith.constant 0 : index
    %3 = vector.load %arg2[%c0, %c0_1] : memref<16x128xbf16, #tpu.memory_space<vmem>>, vector<16x128xbf16>
    %c0_2 = arith.constant 0 : index
    %c0_3 = arith.constant 0 : index
    %4 = vector.load %arg3[%c0_2, %c0_3] : memref<128x128xbf16, #tpu.memory_space<vmem>>, vector<128x128xbf16>
    %cst = arith.constant dense<0.000000e+00> : vector<16x128xf32>
    %5 = tpu.matmul %3, %4, %cst {dimension_numbers = #tpu.dot_dimension_numbers<[1], [0], [0], [1], [0, 0, 1, 1], [], []>} : vector<16x128xbf16>, vector<128x128xbf16>, vector<16x128xf32> -> vector<16x128xf32>
    %c0_4 = arith.constant 0 : index
    %c0_5 = arith.constant 0 : index
    %6 = vector.load %arg4[%c0_4, %c0_5] : memref<1x128xf32, #tpu.memory_space<vmem>>, vector<1x128xf32>
    %7 = vector.broadcast %6 : vector<1x128xf32> to vector<16x128xf32>
    %8 = arith.addf %5, %7 : vector<16x128xf32>
    %c0_6 = arith.constant 0 : index
    %c0_7 = arith.constant 0 : index
    %9 = vector.load %arg5[%c0_6, %c0_7] : memref<128x128xbf16, #tpu.memory_space<vmem>>, vector<128x128xbf16>
    %cst_8 = arith.constant dense<0.000000e+00> : vector<16x128xf32>
    %10 = tpu.matmul %3, %9, %cst_8 {dimension_numbers = #tpu.dot_dimension_numbers<[1], [0], [0], [1], [0, 0, 1, 1], [], []>} : vector<16x128xbf16>, vector<128x128xbf16>, vector<16x128xf32> -> vector<16x128xf32>
    %c0_9 = arith.constant 0 : index
    %c0_10 = arith.constant 0 : index
    %11 = vector.load %arg6[%c0_9, %c0_10] : memref<1x128xf32, #tpu.memory_space<vmem>>, vector<1x128xf32>
    %12 = vector.broadcast %11 : vector<1x128xf32> to vector<16x128xf32>
    %13 = arith.addf %10, %12 : vector<16x128xf32>
    %14 = arith.negf %8 : vector<16x128xf32>
    %15 = math.exp %14 : vector<16x128xf32>
    %cst_11 = arith.constant 1.000000e+00 : f32
    %16 = vector.broadcast %cst_11 : f32 to vector<16x128xf32>
    %17 = arith.addf %16, %15 : vector<16x128xf32>
    %18 = arith.divf %16, %17 : vector<16x128xf32>
    %19 = arith.mulf %8, %18 : vector<16x128xf32>
    %20 = arith.mulf %19, %13 : vector<16x128xf32>
    %c0_12 = arith.constant 0 : index
    %c0_13 = arith.constant 0 : index
    %21 = vector.load %arg10[%c0_12, %c0_13] : memref<16x128xf32, #tpu.memory_space<vmem>>, vector<16x128xf32>
    %22 = arith.truncf %20 : vector<16x128xf32> to vector<16x128xbf16>
    %c0_14 = arith.constant 0 : index
    %c0_15 = arith.constant 0 : index
    %23 = vector.load %arg7[%c0_14, %c0_15] : memref<128x128xbf16, #tpu.memory_space<vmem>>, vector<128x128xbf16>
    %cst_16 = arith.constant dense<0.000000e+00> : vector<16x128xf32>
    %24 = tpu.matmul %22, %23, %cst_16 {dimension_numbers = #tpu.dot_dimension_numbers<[1], [0], [0], [1], [0, 0, 1, 1], [], []>} : vector<16x128xbf16>, vector<128x128xbf16>, vector<16x128xf32> -> vector<16x128xf32>
    %25 = arith.addf %21, %24 : vector<16x128xf32>
    %c0_17 = arith.constant 0 : index
    %c0_18 = arith.constant 0 : index
    %26 = vector.load %arg10[%c0_17, %c0_18] : memref<16x128xf32, #tpu.memory_space<vmem>>, vector<16x128xf32>
    tpu.vector_store %arg10[%c0_17, %c0_18], %25 {strides = array<i32>} : memref<16x128xf32, #tpu.memory_space<vmem>>, vector<16x128xf32>,
    %c0_i32_19 = arith.constant 0 : i32
    %27 = arith.cmpi eq, %arg1, %c0_i32_19 : i32
    %28 = arith.extui %27 : i1 to i32
    %c0_i32_20 = arith.constant 0 : i32
    %29 = arith.cmpi ne, %28, %c0_i32_20 : i32
    scf.if %29 {
      %c0_21 = arith.constant 0 : index
      %c0_22 = arith.constant 0 : index
      %30 = vector.load %arg10[%c0_21, %c0_22] : memref<16x128xf32, #tpu.memory_space<vmem>>, vector<16x128xf32>
      %c0_23 = arith.constant 0 : index
      %c0_24 = arith.constant 0 : index
      %31 = vector.load %arg8[%c0_23, %c0_24] : memref<1x128xf32, #tpu.memory_space<vmem>>, vector<1x128xf32>
      %32 = vector.broadcast %31 : vector<1x128xf32> to vector<16x128xf32>
      %33 = arith.addf %30, %32 : vector<16x128xf32>
      %c0_25 = arith.constant 0 : index
      %c0_26 = arith.constant 0 : index
      %34 = vector.load %arg9[%c0_25, %c0_26] : memref<16x128xf32, #tpu.memory_space<vmem>>, vector<16x128xf32>
      tpu.vector_store %arg9[%c0_25, %c0_26], %33 {strides = array<i32>} : memref<16x128xf32, #tpu.memory_space<vmem>>, vector<16x128xf32>,
    } else {
    }
    return
  }
  func.func @transform_0(%arg0: i32, %arg1: i32) -> (i32, i32) {
    %c0_i32 = arith.constant 0 : i32
    %c0_i32_0 = arith.constant 0 : i32
    return %arg0, %c0_i32 : i32, i32
  }
  func.func @transform_1(%arg0: i32, %arg1: i32) -> (i32, i32) {
    %c0_i32 = arith.constant 0 : i32
    %c0_i32_0 = arith.constant 0 : i32
    return %c0_i32, %arg1 : i32, i32
  }
  func.func @transform_2(%arg0: i32, %arg1: i32) -> (i32, i32) {
    %c0_i32 = arith.constant 0 : i32
    %c0_i32_0 = arith.constant 0 : i32
    return %c0_i32, %arg1 : i32, i32
  }
  func.func @transform_3(%arg0: i32, %arg1: i32) -> (i32, i32) {
    %c0_i32 = arith.constant 0 : i32
    %c0_i32_0 = arith.constant 0 : i32
    return %c0_i32, %arg1 : i32, i32
  }
  func.func @transform_4(%arg0: i32, %arg1: i32) -> (i32, i32) {
    %c0_i32 = arith.constant 0 : i32
    %c0_i32_0 = arith.constant 0 : i32
    return %c0_i32, %arg1 : i32, i32
  }
  func.func @transform_5(%arg0: i32, %arg1: i32) -> (i32, i32) {
    %c0_i32 = arith.constant 0 : i32
    %c0_i32_0 = arith.constant 0 : i32
    return %arg1, %c0_i32 : i32, i32
  }
  func.func @transform_6(%arg0: i32, %arg1: i32) -> (i32, i32) {
    %c0_i32 = arith.constant 0 : i32
    %c0_i32_0 = arith.constant 0 : i32
    %c0_i32_1 = arith.constant 0 : i32
    return %c0_i32, %c0_i32_0 : i32, i32
  }
  func.func @transform_7(%arg0: i32, %arg1: i32) -> (i32, i32) {
    %c0_i32 = arith.constant 0 : i32
    %c0_i32_0 = arith.constant 0 : i32
    return %arg0, %c0_i32 : i32, i32
  }
}

</mosaic_0001>

<bundles_post_ra>
// kernel: tpu_custom_call.1
= control target key start
LH: loop header
LB: loop body
LE: loop exit
PB: predicated region body
PF: predicated region fallthrough
CT: control target
= control target key end

     0   :  { %12 = vsyncpa [#allocation4], 0  ;;  %s939_s0 = inlined_call_operand.hbm [shape: bf16[16,128], index: 0, kind: input, shape index: {}]   ;;  %s940_s1 = inlined_call_operand.hbm [shape: bf16[128,128], index: 1, kind: input, shape index: {}]   ;;  %s941_s2 = inlined_call_operand.vmem [shape: f32[1,128], index: 2, kind: input, shape index: {}]   ;;  %s942_s3 = inlined_call_operand.hbm [shape: bf16[128,128], index: 3, kind: input, shape index: {}]   ;;  %s943_s4 = inlined_call_operand.vmem [shape: f32[1,128], index: 4, kind: input, shape index: {}]   ;;  %s944_s5 = inlined_call_operand.hbm [shape: bf16[128,128], index: 5, kind: input, shape index: {}]   ;;  %s945_s6 = inlined_call_operand.vmem [shape: f32[1,128], index: 6, kind: input, shape index: {}]   ;;  %s946_s7 = inlined_call_operand.hbm [shape: f32[16,128], index: 7, kind: output, shape index: {}]  }
   0x1   :  { %13 = vsyncpa [#allocation7], 0 }
   0x2   :  { %14 = vsyncpa [#allocation10], 0 }
   0x3   :  { %15 = vsyncpa [#allocation5], 0  ;;  %s763_s24 = smov [#allocation6]   ;;  %s764_s26 = smov [#allocation3]  }
   0x4   :  { %s33_s25 = sshll.u32 %s763_s24, 4  ;;  %s21_s27 = sshll.u32 %s764_s26, 4  ;;  %s34_s25 = int_to_ptr.vmem [resolvable:$true] %s33_s25  ;;  %s814_s27 = int_to_ptr.vmem [resolvable:$true] %s21_s27 }
   0x5   :  { %s645_s30 = scalar_lea.hbm %s940_s1, 1024 }
   0x6   :  { %p646_p0 = scmp.ne.s32.totalorder %s940_s1, %s645_s30  ;;  %p649_p1 = scmp.lt.u32.totalorder %s645_s30, %s940_s1 }
   0x8   :  { %p651_p2 = pnand %p649_p1, %p646_p0 }
   0xa   :  { %654 = shalt.err (!%p651_p2)
}
   0xb   :  { %s655_s12 = scalar_lea.vmem %s34_s25, 1024  ;;  %p660_p4 = scmp.lt.s32.totalorder %s34_s25, %s34_s25 }
   0xc   :  { %p656_p3 = scmp.ne.s32.totalorder %s34_s25, %s655_s12  ;;  %p661_p5 = scmp.lt.s32.totalorder %s655_s12, %s655_s12 }
   0xe   :  { %p662_p6 = por %p661_p5, %p660_p4 }
  0x10   :  { %p663_p7 = pnand %p662_p6, %p656_p3 }
  0x12   :  { %666 = shalt.err (!%p663_p7)
}
  0x13   :  { %s765_s13 = smov 64   ;;  %s766_s14 = smov 4  }
  0x14   :  { %39 = dma.hbm_to_vmem [thread:$0]  %s940_s1, 1024, %s34_s25, [#allocation7], %s765_s13, %s765_s13, %s766_s14  }
  0x15   :  { %s667_s19 = scalar_lea.hbm %s939_s0, 128 }
  0x16   :  { %p668_p8 = scmp.ne.s32.totalorder %s939_s0, %s667_s19  ;;  %p671_p9 = scmp.lt.u32.totalorder %s667_s19, %s939_s0 }
  0x18   :  { %p673_p10 = pnand %p671_p9, %p668_p8 }
  0x1a   :  { %676 = shalt.err (!%p673_p10)
}
  0x1b   :  { %s677_s24 = scalar_lea.vmem %s814_s27, 128  ;;  %p682_p12 = scmp.lt.s32.totalorder %s814_s27, %s814_s27 }
  0x1c   :  { %p678_p11 = scmp.ne.s32.totalorder %s814_s27, %s677_s24  ;;  %p683_p13 = scmp.lt.s32.totalorder %s677_s24, %s677_s24 }
  0x1e   :  { %p684_p0 = por %p683_p13, %p682_p12 }
  0x20   :  { %p685_p1 = pnand %p684_p0, %p678_p11 }
  0x22   :  { %688 = shalt.err (!%p685_p1)
}
  0x23   :  { %27 = dma.hbm_to_vmem [thread:$0]  %s939_s0, 128, %s814_s27, [#allocation4], %s765_s13, %s765_s13, %s766_s14  }
  0x24   :  { %s767_s26 = smov [#allocation8]   ;;  %s768_s29 = smov [#allocation9]  }
  0x25   :  { %s47_s28 = sshll.u32 %s767_s26, 4  ;;  %s61_s30 = sshll.u32 %s768_s29, 4  ;;  %s48_s28 = int_to_ptr.vmem [resolvable:$true] %s47_s28  ;;  %s851_s30 = int_to_ptr.vmem [resolvable:$true] %s61_s30 }
  0x26   :  { %s689_s10 = scalar_lea.hbm %s942_s3, 1024 }
  0x27   :  { %p690_p2 = scmp.ne.s32.totalorder %s942_s3, %s689_s10  ;;  %p693_p3 = scmp.lt.u32.totalorder %s689_s10, %s942_s3 }
  0x29   :  { %p695_p4 = pnand %p693_p3, %p690_p2 }
  0x2b   :  { %698 = shalt.err (!%p695_p4)
}
  0x2c   :  { %s699_s0 = scalar_lea.vmem %s48_s28, 1024  ;;  %p704_p6 = scmp.lt.s32.totalorder %s48_s28, %s48_s28 }
  0x2d   :  { %p700_p5 = scmp.ne.s32.totalorder %s48_s28, %s699_s0  ;;  %p705_p7 = scmp.lt.s32.totalorder %s699_s0, %s699_s0 }
  0x2f   :  { %p706_p8 = por %p705_p7, %p704_p6 }
  0x31   :  { %p707_p9 = pnand %p706_p8, %p700_p5 }
  0x33   :  { %710 = shalt.err (!%p707_p9)
}
  0x34   :  { %53 = dma.hbm_to_vmem [thread:$0]  %s942_s3, 1024, %s48_s28, [#allocation7], %s765_s13, %s765_s13, %s766_s14  }
  0x35   :  { %s711_s20 = scalar_lea.hbm %s944_s5, 1024 }
  0x36   :  { %p712_p10 = scmp.ne.s32.totalorder %s944_s5, %s711_s20  ;;  %p715_p11 = scmp.lt.u32.totalorder %s711_s20, %s944_s5 }
  0x38   :  { %p717_p12 = pnand %p715_p11, %p712_p10 }
  0x3a   :  { %720 = shalt.err (!%p717_p12)
}
  0x3b   :  { %s721_s1 = scalar_lea.vmem %s851_s30, 1024  ;;  %p726_p0 = scmp.lt.s32.totalorder %s851_s30, %s851_s30 }
  0x3c   :  { %p722_p13 = scmp.ne.s32.totalorder %s851_s30, %s721_s1  ;;  %p727_p1 = scmp.lt.s32.totalorder %s721_s1, %s721_s1 }
  0x3e   :  { %p728_p2 = por %p727_p1, %p726_p0 }
  0x40   :  { %p729_p3 = pnand %p728_p2, %p722_p13 }
  0x42   :  { %732 = shalt.err (!%p729_p3)
}
  0x43   :  { %67 = dma.hbm_to_vmem [thread:$0]  %s944_s5, 1024, %s851_s30, [#allocation10], %s765_s13, %s765_s13, %s766_s14  }
  0x44   :  { %755 = dma.done.wait [#allocation4], 128  }
  0x45   :  { %756 = vsyncadd [#allocation4], 4294967168 }
  0x46   :  { %757 = dma.done.wait [#allocation7], 2048  }
  0x47   :  { %758 = vsyncadd [#allocation7], 4294965248 }
  0x48   :  { %759 = dma.done.wait [#allocation10], 1024  }
  0x49   :  { %760 = vsyncadd [#allocation10], 4294966272  ;;  %v769_v0 = vmov 0.0   ;;  %vm770_vm0 = vmmov 0   ;;  %v612_v1 = vld [vmem:[#allocation6] sm:$0xff]   ;;  %v613_v2 = vld [vmem:[#allocation6 + $0x8] sm:$0xff]  }
  0x4a   :  { %541 = vmatprep.subr.bf16.mxu0 %v769_v0  ;;  %561 = vmatprep.subr.bf16.mxu1 %v769_v0  ;;  %v614_v3 = vld [vmem:[#allocation6 + $0x10] sm:$0xff]   ;;  %v619_v4 = vld [vmem:[#allocation8] sm:$0xff]   ;;  %v621_v5 = vld [vmem:[#allocation8 + $0x8] sm:$0xff]   ;;  %s771_s29 = smov [#allocation11]  }
  0x4b   :  { %557 = vmatprep.mubr.msk.bf16.mxu0 %vm770_vm0, %v769_v0  ;;  %577 = vmatprep.mubr.msk.bf16.mxu1 %vm770_vm0, %v769_v0  ;;  %v615_v6 = vld [vmem:[#allocation6 + $0x18] sm:$0xff]   ;;  %v623_v7 = vld [vmem:[#allocation8 + $0x10] sm:$0xff]   ;;  %v616_v8 = vld [vmem:[#allocation6 + $0x20] sm:$0xff]   ;;  %s470_s30 = sshll.u32 %s771_s29, 4  ;;  %s471_s30 = int_to_ptr.vmem [resolvable:$true] %s470_s30 }
  0x4c   :  { %542 = vmatpush3.bf16.msra.mxu0 %v612_v1  ;;  %562 = vmatpush3.bf16.msra.mxu1 %v619_v4  ;;  %v617_v9 = vld [vmem:[#allocation6 + $0x28] sm:$0xff]   ;;  %v624_v10 = vld [vmem:[#allocation8 + $0x18] sm:$0xff]   ;;  %v625_v11 = vld [vmem:[#allocation8 + $0x20] sm:$0xff]   ;;  %p738_p5 = scmp.lt.s32.totalorder %s471_s30, %s471_s30 }
  0x4d   :  { %543 = vmatprep.subr.bf16.mxu0 %v769_v0  ;;  %563 = vmatprep.subr.bf16.mxu1 %v769_v0  ;;  %v618_v12 = vld [vmem:[#allocation6 + $0x30] sm:$0xff]   ;;  %v626_v13 = vld [vmem:[#allocation8 + $0x28] sm:$0xff]   ;;  %v620_v14 = vld [vmem:[#allocation6 + $0x38] sm:$0xff]  }
  0x4e   :  { %v622_v15 = vld [vmem:[#allocation3] sm:$0xff]   ;;  %v627_v16 = vld [vmem:[#allocation8 + $0x30] sm:$0xff]   ;;  %v629_v18 = vld [vmem:[#allocation9] sm:$0xff]  }
  0x4f   :  { %v628_v17 = vld [vmem:[#allocation8 + $0x38] sm:$0xff]   ;;  %v630_v19 = vld [vmem:[#allocation9 + $0x8] sm:$0xff]   ;;  %v631_v20 = vld [vmem:[#allocation9 + $0x10] sm:$0xff]  }
  0x50   :  { %544 = vmatpush3.bf16.msra.mxu0 %v613_v2  ;;  %564 = vmatpush3.bf16.msra.mxu1 %v621_v5  ;;  %v632_v21 = vld [vmem:[#allocation9 + $0x18] sm:$0xff]   ;;  %v633_v22 = vld [vmem:[#allocation9 + $0x20] sm:$0xff]   ;;  %v634_v23 = vld [vmem:[#allocation9 + $0x28] sm:$0xff]  }
  0x51   :  { %545 = vmatprep.subr.bf16.mxu0 %v769_v0  ;;  %565 = vmatprep.subr.bf16.mxu1 %v769_v0  ;;  %v635_v24 = vld [vmem:[#allocation9 + $0x30] sm:$0xff]   ;;  %v636_v25 = vld [vmem:[#allocation9 + $0x38] sm:$0xff]  }
  0x52   :  { %v484_v26 = vld [vmem:[%s941_s2] ss:$0 sm:$0xff] }
  0x53   :  { %v494_v43 = vld [vmem:[%s943_s4] ss:$0 sm:$0xff]  ;;  %s733_s4 = scalar_lea.vmem %s471_s30, 256 }
  0x54   :  { %546 = vmatpush3.bf16.msra.mxu0 %v614_v3  ;;  %566 = vmatpush3.bf16.msra.mxu1 %v623_v7  ;;  %v513_v53 = vld [vmem:[%s945_s6] ss:$0 sm:$0xff]  ;;  %p734_p4 = scmp.ne.s32.totalorder %s471_s30, %s733_s4  ;;  %p739_p6 = scmp.lt.s32.totalorder %s733_s4, %s733_s4 }
  0x55   :  { %547 = vmatprep.subr.bf16.mxu0 %v769_v0  ;;  %567 = vmatprep.subr.bf16.mxu1 %v769_v0 }
  0x56   :  { %p740_p7 = por %p739_p6, %p738_p5 }
  0x58   :  { %548 = vmatpush3.bf16.msra.mxu0 %v615_v6  ;;  %568 = vmatpush3.bf16.msra.mxu1 %v624_v10  ;;  %p741_p8 = pnand %p740_p7, %p734_p4 }
  0x59   :  { %549 = vmatprep.subr.bf16.mxu0 %v769_v0  ;;  %569 = vmatprep.subr.bf16.mxu1 %v769_v0 }
  0x5c   :  { %550 = vmatpush3.bf16.msra.mxu0 %v616_v8  ;;  %570 = vmatpush3.bf16.msra.mxu1 %v625_v11 }
  0x5d   :  { %551 = vmatprep.subr.bf16.mxu0 %v769_v0  ;;  %571 = vmatprep.subr.bf16.mxu1 %v769_v0 }
  0x60   :  { %552 = vmatpush3.bf16.msra.mxu0 %v617_v9  ;;  %572 = vmatpush3.bf16.msra.mxu1 %v626_v13 }
  0x61   :  { %553 = vmatprep.subr.bf16.mxu0 %v769_v0  ;;  %573 = vmatprep.subr.bf16.mxu1 %v769_v0 }
  0x64   :  { %554 = vmatpush3.bf16.msra.mxu0 %v618_v12  ;;  %574 = vmatpush3.bf16.msra.mxu1 %v627_v16 }
  0x65   :  { %555 = vmatprep.subr.bf16.mxu0 %v769_v0  ;;  %575 = vmatprep.subr.bf16.mxu1 %v769_v0 }
  0x68   :  { %556 = vmatpush3.bf16.msra.mxu0 %v620_v14  ;;  %576 = vmatpush3.bf16.msra.mxu1 %v628_v17 }
  0x69   :  { %581 = vmatprep.subr.bf16.mxu0 %v769_v0 }
  0x6b   :  { %558 = vmatmul.mubr.bf16.vlgmr.msra.gmra.mrb[0].mxu0 %v622_v15  ;;  %578 = vmatmul.mubr.bf16.vlgmr.msra.gmra.mrb[0].mxu1 %v622_v15 }
  0x6c   :  { %597 = vmatprep.mubr.msk.bf16.mxu0 %vm770_vm0, %v769_v0  ;;  %582 = vmatpush3.bf16.msra.mxu0 %v629_v18 }
  0x6d   :  { %583 = vmatprep.subr.bf16.mxu0 %v769_v0 }
  0x70   :  { %584 = vmatpush3.bf16.msra.mxu0 %v630_v19 }
  0x71   :  { %585 = vmatprep.subr.bf16.mxu0 %v769_v0 }
  0x74   :  { %586 = vmatpush3.bf16.msra.mxu0 %v631_v20 }
  0x75   :  { %587 = vmatprep.subr.bf16.mxu0 %v769_v0 }
  0x78   :  { %588 = vmatpush3.bf16.msra.mxu0 %v632_v21 }
  0x79   :  { %589 = vmatprep.subr.bf16.mxu0 %v769_v0 }
  0x7c   :  { %590 = vmatpush3.bf16.msra.mxu0 %v633_v22 }
  0x7d   :  { %591 = vmatprep.subr.bf16.mxu0 %v769_v0 }
  0x80   :  { %592 = vmatpush3.bf16.msra.mxu0 %v634_v23 }
  0x81   :  { %593 = vmatprep.subr.bf16.mxu0 %v769_v0 }
  0x84   :  { %594 = vmatpush3.bf16.msra.mxu0 %v635_v24 }
  0x85   :  { %595 = vmatprep.subr.bf16.mxu0 %v769_v0 }
  0x88   :  { %596 = vmatpush3.bf16.msra.mxu0 %v636_v25 }
 0x13e   :  { %v202_v27 = vpop.f32.mrb[0].mxu0  ;;  %v314_v35 = vpop.f32.mrb[0].mxu1 }
 0x13f   :  { %v203_v28 = vadd.f32 %v484_v26, %v202_v27  ;;  %v559_v29 = vpop.f32.mrb[1].mxu0  ;;  %v579_v36 = vpop.f32.mrb[1].mxu1  ;;  %v315_v44 = vadd.f32 %v494_v43, %v314_v35 }
 0x140   :  { %v205_v30 = vpop.f32.mrb[2].mxu0  ;;  %v317_v37 = vpop.f32.mrb[2].mxu1 }
 0x141   :  { %v503_v31 = vmul.f32 -1.442695, %v203_v28  ;;  %v206_v32 = vadd.f32 %v484_v26, %v205_v30  ;;  %v560_v33 = vpop.f32.mrb[3].mxu0  ;;  %v580_v38 = vpop.f32.mrb[3].mxu1  ;;  %v318_v50 = vadd.f32 %v494_v43, %v317_v37 }
 0x143   :  { %637 = vpow2.f32 %v503_v31  ;;  %v504_v34 = vmul.f32 -1.442695, %v206_v32 }
 0x145   :  { %639 = vpow2.f32 %v504_v34 }
 0x14d   :  { %v638_v39 = vpop.eup %637 }
 0x14e   :  { %v327_v40 = vadd.f32 1.0, %v638_v39 }
 0x14f   :  { %v640_v41 = vpop.eup %639 }
 0x150   :  { %641 = vrcp.f32 %v327_v40  ;;  %v328_v42 = vadd.f32 1.0, %v640_v41 }
 0x152   :  { %643 = vrcp.f32 %v328_v42 }
 0x15a   :  { %v642_v45 = vpop.eup %641 }
 0x15b   :  { %v333_v46 = vmul.f32 %v642_v45, %v203_v28 }
 0x15c   :  { %v644_v47 = vpop.eup %643 }
 0x15d   :  { %v334_v48 = vmul.f32 %v644_v47, %v206_v32  ;;  %v335_v49 = vmul.f32 %v333_v46, %v315_v44 }
 0x15f   :  { %v336_v51 = vmul.f32 %v334_v48, %v318_v50 }
 0x161   :  { %v339_v52 = vpack.c.bf16 %v336_v51, %v335_v49 }
 0x163   :  { %598 = vmatmul.mubr.bf16.vlgmr.msra.gmra.mrb[4].mxu0 %v339_v52 }
 0x236   :  { %v438_v54 = vpop.f32.mrb[4].mxu0 }
 0x237   :  { %v461_v55 = vadd.f32 %v513_v53, %v438_v54  ;;  %v599_v56 = vpop.f32.mrb[5].mxu0 }
 0x238   :  { %v441_v57 = vpop.f32.mrb[6].mxu0 }
 0x239   :  { %463 = vst [vmem:[#allocation11] sm:$0xff] %v461_v55  ;;  %v462_v58 = vadd.f32 %v513_v53, %v441_v57  ;;  %v600_v59 = vpop.f32.mrb[7].mxu0 }
 0x23b   :  { %464 = vst [vmem:[#allocation11 + $0x8] sm:$0xff] %v462_v58 }
 0x23c   :  { %744 = shalt.err (!%p741_p8)
}
 0x23d   :  { %s745_s9 = scalar_lea.hbm %s946_s7, 256 }
 0x23e   :  { %p746_p9 = scmp.ne.s32.totalorder %s946_s7, %s745_s9  ;;  %p749_p10 = scmp.lt.u32.totalorder %s745_s9, %s946_s7 }
 0x240   :  { %p751_p11 = pnand %p749_p10, %p746_p9 }
 0x242   :  { %754 = shalt.err (!%p751_p11)
}
 0x243   :  { %s772_s16 = smov 128   ;;  %s773_s0 = smov 8  }
 0x244   :  { %476 = dma.vmem_to_hbm [thread:$0]  %s471_s30, 256, %s946_s7, [#allocation5], %s772_s16, %s772_s16, %s773_s0  }
 0x245   :  { %761 = dma.done.wait [#allocation5], 256  }
 0x246   :  { %762 = vsyncadd [#allocation5], 4294967040 }
 0x247   :  { %480 = vsyncpa [#allocation4], 1 }
 0x248   :  { %481 = vsyncpa [#allocation7], 1 }
 0x249   :  { %482 = vsyncpa [#allocation10], 1 }
 0x24a   :  { %483 = vsyncpa [#allocation5], 1 }

</bundles_post_ra>
